<compile_context>
chip_gen: v6e
topology: v6e:2x2x1
jax: 0.10.0
libtpu: 0.0.40
codegen_flags: <defaults>
</compile_context>

<pallas_src>
import functools

import jax
import jax.numpy as jnp
from jax.experimental import pallas as pl
from jax.experimental.pallas import tpu as pltpu


LANE = 128          # TPU lane width
SUBLANE = 8         # TPU sublane width (f32)
TM_MAX = 2048       # max batch-tile rows; ~7 MB peak VMEM at bf16 compute


def _cdiv(a, b):
    return -(-a // b)


def _round_up(n, m):
    return ((n + m - 1) // m) * m


def _choose_tile(batch, tm_max):
    """Pick (tm, num_tiles) minimizing last-tile waste; aim for >=2 tiles on
    large batches so the 'parallel' batch axis can split across v7x's 2 TCs."""
    min_tiles = 2 if batch >= 512 else 1
    n_tiles = max(_cdiv(batch, tm_max), min_tiles)
    tm = _round_up(_cdiv(batch, n_tiles), SUBLANE)
    if tm >= batch:
        tm = batch  # single full-extent tile (block == full dim -> always legal)
    return tm, _cdiv(batch, tm)


def _mlp_kernel(x_ref,
                w1_ref, b1_ref,
                w2_ref, b2_ref,
                w3_ref, b3_ref,
                w4_ref, b4_ref,
                o_ref,
                *, compute_dtype):
    """Fused forward: relu(relu(relu(xW1+b1)W2+b2)W3+b3)W4+b4 for one batch tile.

    Matmuls run in `compute_dtype` (bf16 by default) with f32 MXU accumulation;
    bias add + ReLU stay in f32.
    """
    x = x_ref[...].astype(compute_dtype)

    h = jnp.dot(x, w1_ref[...], preferred_element_type=jnp.float32) + b1_ref[...]
    h = jnp.maximum(h, 0.0).astype(compute_dtype)

    h = jnp.dot(h, w2_ref[...], preferred_element_type=jnp.float32) + b2_ref[...]
    h = jnp.maximum(h, 0.0).astype(compute_dtype)

    h = jnp.dot(h, w3_ref[...], preferred_element_type=jnp.float32) + b3_ref[...]
    h = jnp.maximum(h, 0.0).astype(compute_dtype)

    out = jnp.dot(h, w4_ref[...], preferred_element_type=jnp.float32) + b4_ref[...]
    o_ref[...] = out.astype(o_ref.dtype)


def mimo_regressor_forward(x, params, *, tm_max=TM_MAX,
                           compute_dtype=jnp.bfloat16):
    """Run the fused MLP Pallas kernel.

    x       : (batch, input_features) float32 -- passed to the kernel unpadded.
    params  : dict with w1,b1,w2,b2,w3,b3,w4,b4
              wK has shape (in_dim, out_dim), bK has shape (1, out_dim)
    returns : (batch, output_features) float32
    """
    batch, in_features = x.shape
    out_features = params["w4"].shape[1]
    h1 = params["w1"].shape[1]              # 32
    h1_p = _round_up(h1, LANE)              # 32 -> 128 (weights only; free MXU-wise)
    h2 = params["w2"].shape[1]              # 128

    wdt = compute_dtype
    f32 = jnp.float32

    # Tiny weight prep (one-time, ~0.2 MB total). Zero-padding the 32-wide
    # hidden layer is numerically identical: padded h1 columns are
    # relu(0*x + 0) = 0 and padded w2 rows are zero.
    w1 = jnp.zeros((in_features, h1_p), wdt).at[:, :h1].set(params["w1"].astype(wdt))
    b1 = jnp.zeros((1, h1_p), f32).at[:, :h1].set(params["b1"].astype(f32))
    w2 = jnp.zeros((h1_p, h2), wdt).at[:h1, :].set(params["w2"].astype(wdt))
    b2 = params["b2"].astype(f32)
    w3 = params["w3"].astype(wdt)
    b3 = params["b3"].astype(f32)
    w4 = params["w4"].astype(wdt)
    b4 = params["b4"].astype(f32)

    tm, nb = _choose_tile(batch, tm_max)

    # Weights/biases: full-array blocks, constant index_map -> VMEM-resident;
    # single-buffered (they never change across the grid).
    def resident(a):
        return pl.BlockSpec(a.shape, lambda i: (0,) * a.ndim,
                            pipeline_mode=pl.Buffered(1))

    kernel = functools.partial(_mlp_kernel, compute_dtype=compute_dtype)

    return pl.pallas_call(
        kernel,
        out_shape=jax.ShapeDtypeStruct((batch, out_features), f32),
        grid=(nb,),
        in_specs=[
            # x streams by batch tile, unpadded last dim (block == full dim).
            pl.BlockSpec((tm, in_features), lambda i: (i, 0)),
            resident(w1), resident(b1),
            resident(w2), resident(b2),
            resident(w3), resident(b3),
            resident(w4), resident(b4),
        ],
        out_specs=pl.BlockSpec((tm, out_features), lambda i: (i, 0)),
        compiler_params=pltpu.CompilerParams(
            dimension_semantics=("parallel",),
            vmem_limit_bytes=32 * 1024 * 1024),
    )(x, w1, b1, w2, b2, w3, b3, w4, b4)


def init_params(key, input_features, output_features):
    """Deterministic init mimicking PyTorch nn.Linear default
    (uniform(-1/sqrt(fan_in), 1/sqrt(fan_in)) for both weight and bias)."""
    dims = [input_features, 32, 128, 256, output_features]
    params = {}
    for i, (fan_in, fan_out) in enumerate(zip(dims[:-1], dims[1:]), start=1):
        key, kw, kb = jax.random.split(key, 3)
        bound = 1.0 / (fan_in ** 0.5)
        params[f"w{i}"] = jax.random.uniform(
            kw, (fan_in, fan_out), jnp.float32, minval=-bound, maxval=bound)
        params[f"b{i}"] = jax.random.uniform(
            kb, (1, fan_out), jnp.float32, minval=-bound, maxval=bound)
    return params


def reference_forward(x, params, compute_dtype=jnp.float32):
    """Pure-JAX reference. With compute_dtype=bf16 it mirrors the kernel's
    bf16-inputs / f32-accumulation matmuls for tight-tolerance checking."""
    def lin(h, w, b):
        return jnp.dot(h.astype(compute_dtype), w.astype(compute_dtype),
                       preferred_element_type=jnp.float32) + b
    h = jnp.maximum(lin(x, params["w1"], params["b1"]), 0.0)
    h = jnp.maximum(lin(h, params["w2"], params["b2"]), 0.0)
    h = jnp.maximum(lin(h, params["w3"], params["b3"]), 0.0)
    return lin(h, params["w4"], params["b4"])


if __name__ == "__main__":
    input_features = 16
    output_features = 8

    key = jax.random.PRNGKey(0)
    key, kx1, kx2 = jax.random.split(key, 3)
    params = init_params(key, input_features, output_features)

    # Case 1: small batch, single tile.
    batch = 8
    x = jax.random.normal(kx1, (batch, input_features), jnp.float32)
    out = jax.block_until_ready(mimo_regressor_forward(x, params))
    ref_matched = reference_forward(x, params, compute_dtype=jnp.bfloat16)
    ref_f32 = reference_forward(x, params)
    assert out.shape == (batch, output_features)
    assert jnp.allclose(out, ref_matched, atol=1e-2, rtol=1e-2), \
        "mismatch vs bf16-matched reference (batch=8)"
    assert jnp.allclose(out, ref_f32, atol=5e-2, rtol=5e-2), \
        "mismatch vs f32 reference (batch=8)"

    # Case 2: ragged multi-tile batch (37 rows, tile 16 -> 3 tiles, last partial):
    # exercises the non-divisible grid + masked boundary DMA path.
    batch2 = 37
    x2 = jax.random.normal(kx2, (batch2, input_features), jnp.float32)
    out2 = jax.block_until_ready(mimo_regressor_forward(x2, params, tm_max=16))
    ref2 = reference_forward(x2, params, compute_dtype=jnp.bfloat16)
    assert out2.shape == (batch2, output_features)
    assert jnp.allclose(out2, ref2, atol=1e-2, rtol=1e-2), \
        "mismatch vs bf16-matched reference (batch=37, ragged tiles)"

    print("KERNEL_OK")
</pallas_src>

<mosaic_0001>
module attributes {stable_mosaic.version = 11 : i64} {
  func.func @_mlp_kernel(%arg0: i32, %arg1: memref<8x16xf32, #tpu.memory_space<vmem>>, %arg2: memref<16x128xbf16, #tpu.memory_space<vmem>>, %arg3: memref<1x128xf32, #tpu.memory_space<vmem>>, %arg4: memref<128x128xbf16, #tpu.memory_space<vmem>>, %arg5: memref<1x128xf32, #tpu.memory_space<vmem>>, %arg6: memref<128x256xbf16, #tpu.memory_space<vmem>>, %arg7: memref<1x256xf32, #tpu.memory_space<vmem>>, %arg8: memref<256x8xbf16, #tpu.memory_space<vmem>>, %arg9: memref<1x8xf32, #tpu.memory_space<vmem>>, %arg10: memref<8x8xf32, #tpu.memory_space<vmem>>) attributes {dimension_semantics = [#tpu.dimension_semantics<parallel>], iteration_bounds = array<i64: 1>, scalar_prefetch = 0 : i64, scratch_operands = 0 : i64, tpu.core_type = #tpu.core_type<tc>, window_params = [{transform_indices = @transform_0, window_bounds = array<i64: 8, 16>}, {pipeline_mode = #tpu.pipeline_mode<synchronous>, transform_indices = @transform_1, window_bounds = array<i64: 16, 128>}, {pipeline_mode = #tpu.pipeline_mode<synchronous>, transform_indices = @transform_2, window_bounds = array<i64: 1, 128>}, {pipeline_mode = #tpu.pipeline_mode<synchronous>, transform_indices = @transform_3, window_bounds = array<i64: 128, 128>}, {pipeline_mode = #tpu.pipeline_mode<synchronous>, transform_indices = @transform_4, window_bounds = array<i64: 1, 128>}, {pipeline_mode = #tpu.pipeline_mode<synchronous>, transform_indices = @transform_5, window_bounds = array<i64: 128, 256>}, {pipeline_mode = #tpu.pipeline_mode<synchronous>, transform_indices = @transform_6, window_bounds = array<i64: 1, 256>}, {pipeline_mode = #tpu.pipeline_mode<synchronous>, transform_indices = @transform_7, window_bounds = array<i64: 256, 8>}, {pipeline_mode = #tpu.pipeline_mode<synchronous>, transform_indices = @transform_8, window_bounds = array<i64: 1, 8>}, {transform_indices = @transform_9, window_bounds = array<i64: 8, 8>}]} {
    %c0 = arith.constant 0 : index
    %c0_0 = arith.constant 0 : index
    %0 = vector.load %arg1[%c0, %c0_0] : memref<8x16xf32, #tpu.memory_space<vmem>>, vector<8x16xf32>
    %1 = arith.truncf %0 : vector<8x16xf32> to vector<8x16xbf16>
    %c0_1 = arith.constant 0 : index
    %c0_2 = arith.constant 0 : index
    %2 = vector.load %arg2[%c0_1, %c0_2] : memref<16x128xbf16, #tpu.memory_space<vmem>>, vector<16x128xbf16>
    %cst = arith.constant dense<0.000000e+00> : vector<8x128xf32>
    %3 = tpu.matmul %1, %2, %cst {dimension_numbers = #tpu.dot_dimension_numbers<[1], [0], [0], [1], [0, 0, 1, 1], [], []>} : vector<8x16xbf16>, vector<16x128xbf16>, vector<8x128xf32> -> vector<8x128xf32>
    %c0_3 = arith.constant 0 : index
    %c0_4 = arith.constant 0 : index
    %4 = vector.load %arg3[%c0_3, %c0_4] : memref<1x128xf32, #tpu.memory_space<vmem>>, vector<1x128xf32>
    %5 = vector.broadcast %4 : vector<1x128xf32> to vector<8x128xf32>
    %6 = arith.addf %3, %5 : vector<8x128xf32>
    %cst_5 = arith.constant 0.000000e+00 : f32
    %7 = vector.broadcast %cst_5 : f32 to vector<8x128xf32>
    %8 = arith.maximumf %6, %7 : vector<8x128xf32>
    %9 = arith.truncf %8 : vector<8x128xf32> to vector<8x128xbf16>
    %c0_6 = arith.constant 0 : index
    %c0_7 = arith.constant 0 : index
    %10 = vector.load %arg4[%c0_6, %c0_7] : memref<128x128xbf16, #tpu.memory_space<vmem>>, vector<128x128xbf16>
    %cst_8 = arith.constant dense<0.000000e+00> : vector<8x128xf32>
    %11 = tpu.matmul %9, %10, %cst_8 {dimension_numbers = #tpu.dot_dimension_numbers<[1], [0], [0], [1], [0, 0, 1, 1], [], []>} : vector<8x128xbf16>, vector<128x128xbf16>, vector<8x128xf32> -> vector<8x128xf32>
    %c0_9 = arith.constant 0 : index
    %c0_10 = arith.constant 0 : index
    %12 = vector.load %arg5[%c0_9, %c0_10] : memref<1x128xf32, #tpu.memory_space<vmem>>, vector<1x128xf32>
    %13 = vector.broadcast %12 : vector<1x128xf32> to vector<8x128xf32>
    %14 = arith.addf %11, %13 : vector<8x128xf32>
    %cst_11 = arith.constant 0.000000e+00 : f32
    %15 = vector.broadcast %cst_11 : f32 to vector<8x128xf32>
    %16 = arith.maximumf %14, %15 : vector<8x128xf32>
    %17 = arith.truncf %16 : vector<8x128xf32> to vector<8x128xbf16>
    %c0_12 = arith.constant 0 : index
    %c0_13 = arith.constant 0 : index
    %18 = vector.load %arg6[%c0_12, %c0_13] : memref<128x256xbf16, #tpu.memory_space<vmem>>, vector<128x256xbf16>
    %cst_14 = arith.constant dense<0.000000e+00> : vector<8x256xf32>
    %19 = tpu.matmul %17, %18, %cst_14 {dimension_numbers = #tpu.dot_dimension_numbers<[1], [0], [0], [1], [0, 0, 1, 1], [], []>} : vector<8x128xbf16>, vector<128x256xbf16>, vector<8x256xf32> -> vector<8x256xf32>
    %c0_15 = arith.constant 0 : index
    %c0_16 = arith.constant 0 : index
    %20 = vector.load %arg7[%c0_15, %c0_16] : memref<1x256xf32, #tpu.memory_space<vmem>>, vector<1x256xf32>
    %21 = vector.broadcast %20 : vector<1x256xf32> to vector<8x256xf32>
    %22 = arith.addf %19, %21 : vector<8x256xf32>
    %cst_17 = arith.constant 0.000000e+00 : f32
    %23 = vector.broadcast %cst_17 : f32 to vector<8x256xf32>
    %24 = arith.maximumf %22, %23 : vector<8x256xf32>
    %25 = arith.truncf %24 : vector<8x256xf32> to vector<8x256xbf16>
    %c0_18 = arith.constant 0 : index
    %c0_19 = arith.constant 0 : index
    %26 = vector.load %arg8[%c0_18, %c0_19] : memref<256x8xbf16, #tpu.memory_space<vmem>>, vector<256x8xbf16>
    %cst_20 = arith.constant dense<0.000000e+00> : vector<8x8xf32>
    %27 = tpu.matmul %25, %26, %cst_20 {dimension_numbers = #tpu.dot_dimension_numbers<[1], [0], [0], [1], [0, 0, 1, 1], [], []>} : vector<8x256xbf16>, vector<256x8xbf16>, vector<8x8xf32> -> vector<8x8xf32>
    %c0_21 = arith.constant 0 : index
    %c0_22 = arith.constant 0 : index
    %28 = vector.load %arg9[%c0_21, %c0_22] : memref<1x8xf32, #tpu.memory_space<vmem>>, vector<1x8xf32>
    %29 = vector.broadcast %28 : vector<1x8xf32> to vector<8x8xf32>
    %30 = arith.addf %27, %29 : vector<8x8xf32>
    %c0_23 = arith.constant 0 : index
    %c0_24 = arith.constant 0 : index
    %31 = vector.load %arg10[%c0_23, %c0_24] : memref<8x8xf32, #tpu.memory_space<vmem>>, vector<8x8xf32>
    tpu.vector_store %arg10[%c0_23, %c0_24], %30 {strides = array<i32>} : memref<8x8xf32, #tpu.memory_space<vmem>>, vector<8x8xf32>,
    return
  }
  func.func @transform_0(%arg0: i32) -> (i32, i32) {
    %c0_i32 = arith.constant 0 : i32
    %c0_i32_0 = arith.constant 0 : i32
    return %arg0, %c0_i32 : i32, i32
  }
  func.func @transform_1(%arg0: i32) -> (i32, i32) {
    %c0_i32 = arith.constant 0 : i32
    %c0_i32_0 = arith.constant 0 : i32
    %c0_i32_1 = arith.constant 0 : i32
    return %c0_i32, %c0_i32_0 : i32, i32
  }
  func.func @transform_2(%arg0: i32) -> (i32, i32) {
    %c0_i32 = arith.constant 0 : i32
    %c0_i32_0 = arith.constant 0 : i32
    %c0_i32_1 = arith.constant 0 : i32
    return %c0_i32, %c0_i32_0 : i32, i32
  }
  func.func @transform_3(%arg0: i32) -> (i32, i32) {
    %c0_i32 = arith.constant 0 : i32
    %c0_i32_0 = arith.constant 0 : i32
    %c0_i32_1 = arith.constant 0 : i32
    return %c0_i32, %c0_i32_0 : i32, i32
  }
  func.func @transform_4(%arg0: i32) -> (i32, i32) {
    %c0_i32 = arith.constant 0 : i32
    %c0_i32_0 = arith.constant 0 : i32
    %c0_i32_1 = arith.constant 0 : i32
    return %c0_i32, %c0_i32_0 : i32, i32
  }
  func.func @transform_5(%arg0: i32) -> (i32, i32) {
    %c0_i32 = arith.constant 0 : i32
    %c0_i32_0 = arith.constant 0 : i32
    %c0_i32_1 = arith.constant 0 : i32
    return %c0_i32, %c0_i32_0 : i32, i32
  }
  func.func @transform_6(%arg0: i32) -> (i32, i32) {
    %c0_i32 = arith.constant 0 : i32
    %c0_i32_0 = arith.constant 0 : i32
    %c0_i32_1 = arith.constant 0 : i32
    return %c0_i32, %c0_i32_0 : i32, i32
  }
  func.func @transform_7(%arg0: i32) -> (i32, i32) {
    %c0_i32 = arith.constant 0 : i32
    %c0_i32_0 = arith.constant 0 : i32
    %c0_i32_1 = arith.constant 0 : i32
    return %c0_i32, %c0_i32_0 : i32, i32
  }
  func.func @transform_8(%arg0: i32) -> (i32, i32) {
    %c0_i32 = arith.constant 0 : i32
    %c0_i32_0 = arith.constant 0 : i32
    %c0_i32_1 = arith.constant 0 : i32
    return %c0_i32, %c0_i32_0 : i32, i32
  }
  func.func @transform_9(%arg0: i32) -> (i32, i32) {
    %c0_i32 = arith.constant 0 : i32
    %c0_i32_0 = arith.constant 0 : i32
    return %arg0, %c0_i32 : i32, i32
  }
}

</mosaic_0001>

<bundles_post_ra>
// kernel: tpu_custom_call.1
= control target key start
LH: loop header
LB: loop body
LE: loop exit
PB: predicated region body
PF: predicated region fallthrough
CT: control target
= control target key end

     0   :  { %14 = vsyncpa [#allocation3], 0  ;;  %s989_s0 = inlined_call_operand.vmem [shape: f32[8,16], index: 0, kind: input, shape index: {}]   ;;  %s990_s1 = inlined_call_operand.hbm [shape: bf16[16,128], index: 1, kind: input, shape index: {}]   ;;  %s991_s2 = inlined_call_operand.vmem [shape: f32[1,128], index: 2, kind: input, shape index: {}]   ;;  %s992_s3 = inlined_call_operand.hbm [shape: bf16[128,128], index: 3, kind: input, shape index: {}]   ;;  %s993_s4 = inlined_call_operand.vmem [shape: f32[1,128], index: 4, kind: input, shape index: {}]   ;;  %s994_s5 = inlined_call_operand.vmem [shape: bf16[128,256], index: 5, kind: input, shape index: {}]   ;;  %s995_s6 = inlined_call_operand.vmem [shape: f32[1,256], index: 6, kind: input, shape index: {}]   ;;  %s996_s7 = inlined_call_operand.vmem [shape: bf16[256,8], index: 7, kind: input, shape index: {}]   ;;  %s997_s8 = inlined_call_operand.vmem [shape: f32[1,8], index: 8, kind: input, shape index: {}]   ;;  %s998_s9 = inlined_call_operand.hbm [shape: f32[8,8], index: 9, kind: output, shape index: {}]  }
   0x1   :  { %15 = vsyncpa [#allocation6], 0 }
   0x2   :  { %16 = vsyncpa [#allocation4], 0  ;;  %s811_s30 = smov [#allocation2]  }
   0x3   :  { %s24_s10 = sshll.u32 %s811_s30, 4  ;;  %s25_s10 = int_to_ptr.vmem [resolvable:$true] %s24_s10 }
   0x4   :  { %s753_s11 = scalar_lea.vmem %s25_s10, 128  ;;  %p758_p1 = scmp.lt.s32.totalorder %s25_s10, %s25_s10 }
   0x5   :  { %p754_p0 = scmp.ne.s32.totalorder %s25_s10, %s753_s11  ;;  %p759_p2 = scmp.lt.s32.totalorder %s753_s11, %s753_s11 }
   0x7   :  { %p760_p3 = por %p759_p2, %p758_p1 }
   0x9   :  { %p761_p4 = pnand %p760_p3, %p754_p0 }
   0xb   :  { %764 = shalt.err (!%p761_p4)
}
   0xc   :  { %s812_s12 = smov 64   ;;  %s813_s13 = smov 4  }
   0xd   :  { %30 = dma.hbm_to_vmem [thread:$0]  %s990_s1, 128, %s25_s10, [#allocation3], %s812_s12, %s812_s12, %s813_s13  }
   0xe   :  { %s814_s16 = smov [#allocation5]  }
   0xf   :  { %s38_s17 = sshll.u32 %s814_s16, 4  ;;  %s39_s17 = int_to_ptr.vmem [resolvable:$true] %s38_s17 }
  0x10   :  { %s773_s18 = scalar_lea.vmem %s39_s17, 1024  ;;  %p778_p6 = scmp.lt.s32.totalorder %s39_s17, %s39_s17 }
  0x11   :  { %p774_p5 = scmp.ne.s32.totalorder %s39_s17, %s773_s18  ;;  %p779_p7 = scmp.lt.s32.totalorder %s773_s18, %s773_s18 }
  0x13   :  { %p780_p8 = por %p779_p7, %p778_p6 }
  0x15   :  { %p781_p9 = pnand %p780_p8, %p774_p5 }
  0x17   :  { %784 = shalt.err (!%p781_p9)
}
  0x18   :  { %44 = dma.hbm_to_vmem [thread:$0]  %s992_s3, 1024, %s39_s17, [#allocation6], %s812_s12, %s812_s12, %s813_s13  }
  0x19   :  { %805 = dma.done.wait [#allocation3], 128  }
  0x1a   :  { %806 = vsyncadd [#allocation3], 4294967168 }
  0x1b   :  { %807 = dma.done.wait [#allocation6], 1024  }
  0x1c   :  { %808 = vsyncadd [#allocation6], 4294966272  ;;  %v815_v0 = vmov 0.0   ;;  %vm816_vm0 = vmmov 0   ;;  %v696_v1 = vld [vmem:[#allocation2] sm:$0xff]   ;;  %vm79_vm1 = vcmask 130048   ;;  %v256_v61 = vlaneseq }
  0x1d   :  { %662 = vmatprep.subr.bf16.mxu0 %v815_v0  ;;  %664 = vmatprep.mubr.msk.bf16.mxu0 %vm816_vm0, %v815_v0  ;;  %v62_v2 = vld [vmem:[%s989_s0] sm:$0xff]  ;;  %v698_v5 = vld [vmem:[#allocation5 + $0x30] sm:$0xff]   ;;  %v699_v6 = vld [vmem:[#allocation5 + $0x28] sm:$0xff]   ;;  %v817_v36 = vmov 0   ;;  %vm566_vm2 = vcmask 64512  }
  0x1e   :  { %668 = vmatprep.subr.bf16.mxu1 %v815_v0  ;;  %684 = vmatprep.mubr.msk.bf16.mxu1 %vm816_vm0, %v815_v0  ;;  %v63_v3 = vpack.c.bf16 %v62_v2, %v62_v2  ;;  %v697_v4 = vld [vmem:[#allocation5 + $0x38] sm:$0xff]   ;;  %v700_v7 = vld [vmem:[#allocation5 + $0x20] sm:$0xff]   ;;  %v702_v9 = vld [vmem:[#allocation5 + $0x10] sm:$0xff]   ;;  %v257_v62 = vshrl.u32 %v256_v61, 7 }
  0x1f   :  { %663 = vmatpush3.bf16.msra.mxu0 %v696_v1  ;;  %669 = vmatpush3.bf16.msra.mxu1 %v697_v4  ;;  %v701_v8 = vld [vmem:[#allocation5 + $0x18] sm:$0xff]   ;;  %v703_v10 = vld [vmem:[#allocation5 + $0x8] sm:$0xff]   ;;  %v704_v11 = vld [vmem:[#allocation5] sm:$0xff]  }
  0x20   :  { %670 = vmatprep.subr.bf16.mxu1 %v815_v0  ;;  %v705_v12 = vld [vmem:[%s994_s5 + $0x70] ss:$8 sps:$4 sm:$0xff]   ;;  %v707_v13 = vld [vmem:[%s994_s5 + $0x74] ss:$8 sps:$4 sm:$0xff]   ;;  %v710_v14 = vld [vmem:[%s994_s5 + $0x64] ss:$8 sps:$4 sm:$0xff]  }
  0x21   :  { %346 = vmatprep.subr.bf16.mxu0 %v707_v13  ;;  %v708_v15 = vld [vmem:[%s994_s5 + $0x60] ss:$8 sps:$4 sm:$0xff]   ;;  %v713_v16 = vld [vmem:[%s994_s5 + $0x54] ss:$8 sps:$4 sm:$0xff]   ;;  %v711_v17 = vld [vmem:[%s994_s5 + $0x50] ss:$8 sps:$4 sm:$0xff]  }
  0x22   :  { %665 = vmatmul.mubr.msk.bf16.vlgmr.msra.gmra.mxu0 %vm79_vm1, %v63_v3  ;;  %v716_v18 = vld [vmem:[%s994_s5 + $0x44] ss:$8 sps:$4 sm:$0xff]   ;;  %v714_v19 = vld [vmem:[%s994_s5 + $0x40] ss:$8 sps:$4 sm:$0xff]   ;;  %v719_v20 = vld [vmem:[%s994_s5 + $0x34] ss:$8 sps:$4 sm:$0xff]  }
  0x23   :  { %671 = vmatpush3.bf16.msra.mxu1 %v698_v5  ;;  %347 = vmatpush1.bf16.msra.mxu0 %v705_v12  ;;  %v717_v21 = vld [vmem:[%s994_s5 + $0x30] ss:$8 sps:$4 sm:$0xff]   ;;  %v722_v22 = vld [vmem:[%s994_s5 + $0x24] ss:$8 sps:$4 sm:$0xff]   ;;  %v720_v23 = vld [vmem:[%s994_s5 + $0x20] ss:$8 sps:$4 sm:$0xff]  }
  0x24   :  { %672 = vmatprep.subr.bf16.mxu1 %v815_v0  ;;  %348 = vmatprep.subr.bf16.mxu0 %v710_v14  ;;  %v725_v24 = vld [vmem:[%s994_s5 + $0x14] ss:$8 sps:$4 sm:$0xff]   ;;  %v723_v25 = vld [vmem:[%s994_s5 + $0x10] ss:$8 sps:$4 sm:$0xff]   ;;  %v584_v26 = vld [vmem:[%s991_s2] ss:$0 sm:$0xff] }
  0x25   :  { %v728_v34 = vld [vmem:[%s994_s5 + $0x4] ss:$8 sps:$4 sm:$0xff]   ;;  %v726_v35 = vld [vmem:[%s994_s5] ss:$8 sps:$4 sm:$0xff]   ;;  %378 = vmatprep.mubr.bf16.mxu0 %v817_v36  ;;  %v729_v37 = vld [vmem:[%s996_s7 + $0x78] sm:$0xff]   ;;  %v258_v63 = vsub.s32 0, %v257_v62 }
  0x26   :  { %v730_v38 = vld [vmem:[%s996_s7 + $0x38] sm:$0xff]   ;;  %v731_v39 = vld [vmem:[%s996_s7 + $0x70] sm:$0xff]   ;;  %v733_v41 = vld [vmem:[%s996_s7 + $0x68] sm:$0xff]   ;;  %v262_v1 = vsub.s32 1, %v257_v62 }
  0x27   :  { %673 = vmatpush3.bf16.msra.mxu1 %v699_v6  ;;  %349 = vmatpush1.bf16.msra.mxu0 %v708_v15  ;;  %v732_v40 = vld [vmem:[%s996_s7 + $0x30] sm:$0xff]   ;;  %v734_v42 = vld [vmem:[%s996_s7 + $0x28] sm:$0xff]   ;;  %v735_v43 = vld [vmem:[%s996_s7 + $0x60] sm:$0xff]  }
  0x28   :  { %674 = vmatprep.subr.bf16.mxu1 %v815_v0  ;;  %350 = vmatprep.subr.bf16.mxu0 %v713_v16  ;;  %v736_v44 = vld [vmem:[%s996_s7 + $0x20] sm:$0xff]   ;;  %v737_v45 = vld [vmem:[%s996_s7 + $0x58] sm:$0xff]   ;;  %v739_v47 = vld [vmem:[%s996_s7 + $0x50] sm:$0xff]  }
  0x29   :  { %v738_v46 = vld [vmem:[%s996_s7 + $0x18] sm:$0xff]   ;;  %v740_v48 = vld [vmem:[%s996_s7 + $0x10] sm:$0xff]   ;;  %v587_v49 = vld [vmem:[%s993_s4] ss:$0 sm:$0xff] }
  0x2a   :  { %v741_v57 = vld [vmem:[%s996_s7 + $0x48] sm:$0xff]   ;;  %v743_v59 = vld [vmem:[%s996_s7 + $0x40] sm:$0xff]  }
  0x2b   :  { %675 = vmatpush3.bf16.msra.mxu1 %v700_v7  ;;  %351 = vmatpush1.bf16.msra.mxu0 %v711_v17  ;;  %v742_v58 = vld [vmem:[%s996_s7 + $0x8] sm:$0xff]   ;;  %v744_v60 = vld [vmem:[%s996_s7] sm:$0xff]  }
  0x2c   :  { %676 = vmatprep.subr.bf16.mxu1 %v815_v0  ;;  %352 = vmatprep.subr.bf16.mxu0 %v716_v18  ;;  %v612_v15 = vld [vmem:[%s997_s8] ss:$0 sm:$0xff] }
  0x2f   :  { %677 = vmatpush3.bf16.msra.mxu1 %v701_v8  ;;  %353 = vmatpush1.bf16.msra.mxu0 %v714_v19 }
  0x30   :  { %678 = vmatprep.subr.bf16.mxu1 %v815_v0  ;;  %354 = vmatprep.subr.bf16.mxu0 %v719_v20 }
  0x33   :  { %679 = vmatpush3.bf16.msra.mxu1 %v702_v9  ;;  %355 = vmatpush1.bf16.msra.mxu0 %v717_v21 }
  0x34   :  { %680 = vmatprep.subr.bf16.mxu1 %v815_v0  ;;  %356 = vmatprep.subr.bf16.mxu0 %v722_v22 }
  0x37   :  { %681 = vmatpush3.bf16.msra.mxu1 %v703_v10  ;;  %357 = vmatpush1.bf16.msra.mxu0 %v720_v23 }
  0x38   :  { %682 = vmatprep.subr.bf16.mxu1 %v815_v0  ;;  %358 = vmatprep.subr.bf16.mxu0 %v725_v24  ;;  %v254_v0 = vld [vmem:[%s995_s6] sm:$0x3]  ;;  %s818_s6 = smov [#allocation7]  }
  0x39   :  { %v259_v2 = vrot.slane %v254_v0, %v258_v63  ;;  %v263_v3 = vrot.slane %v254_v0, %v262_v1  ;;  %s574_s17 = sshll.u32 %s818_s6, 4  ;;  %s575_s17 = int_to_ptr.vmem [resolvable:$true] %s574_s17 }
  0x3a   :  { %s785_s18 = scalar_lea.vmem %s575_s17, 128  ;;  %p790_p11 = scmp.lt.s32.totalorder %s575_s17, %s575_s17 }
  0x3b   :  { %683 = vmatpush3.bf16.msra.mxu1 %v704_v11  ;;  %359 = vmatpush1.bf16.msra.mxu0 %v723_v25  ;;  %p786_p10 = scmp.ne.s32.totalorder %s575_s17, %s785_s18  ;;  %p791_p12 = scmp.lt.s32.totalorder %s785_s18, %s785_s18 }
  0x3c   :  { %360 = vmatprep.subr.bf16.mxu0 %v728_v34  ;;  %640 = vmatprep.subr.bf16.mxu1 %v729_v37 }
  0x3d   :  { %p792_p13 = por %p791_p12, %p790_p11 }
  0x3f   :  { %361 = vmatpush1.bf16.msra.mxu0 %v726_v35  ;;  %p793_p0 = pnand %p792_p13, %p786_p10 }
  0xe2   :  { %v117_v27 = vpop.f32.mrf.mxu0 }
  0xe3   :  { %v118_v28 = vadd.f32 %v584_v26, %v117_v27 }
  0xe4   :  { %v666_v29 = vpop.f32.mrf.mxu0 }
  0xe5   :  { %v123_v30 = vmax.f32 %v118_v28, 0.0 }
  0xe6   :  { %v120_v31 = vpop.f32.mrf.mxu0 }
  0xe7   :  { %v124_v32 = vpack.c.bf16 %v123_v30, %v123_v30 }
  0xe8   :  { %v667_v33 = vpop.f32.mrf.mxu0 }
  0xe9   :  { %685 = vmatmul.mubr.bf16.vlgmr.msra.gmra.mxu1 %v124_v32 }
  0xea   :  { %641 = vmatpush3.bf16.msra.mxu1 %v730_v38 }
  0xeb   :  { %642 = vmatprep.subr.bf16.mxu1 %v731_v39 }
  0xee   :  { %643 = vmatpush3.bf16.msra.mxu1 %v732_v40 }
  0xef   :  { %644 = vmatprep.subr.bf16.mxu1 %v733_v41 }
  0xf2   :  { %645 = vmatpush3.bf16.msra.mxu1 %v734_v42 }
  0xf3   :  { %646 = vmatprep.subr.bf16.mxu1 %v735_v43 }
  0xf6   :  { %647 = vmatpush3.bf16.msra.mxu1 %v736_v44 }
  0xf7   :  { %648 = vmatprep.subr.bf16.mxu1 %v737_v45 }
  0xfa   :  { %649 = vmatpush3.bf16.msra.mxu1 %v738_v46 }
  0xfb   :  { %650 = vmatprep.subr.bf16.mxu1 %v739_v47 }
  0xfe   :  { %651 = vmatpush3.bf16.msra.mxu1 %v740_v48 }
  0xff   :  { %652 = vmatprep.subr.bf16.mxu1 %v741_v57 }
 0x102   :  { %653 = vmatpush3.bf16.msra.mxu1 %v742_v58 }
 0x103   :  { %654 = vmatprep.subr.bf16.mxu1 %v743_v59 }
 0x106   :  { %655 = vmatpush3.bf16.msra.mxu1 %v744_v60 }
 0x1a9   :  { %v230_v50 = vpop.f32.mrf.mxu1 }
 0x1aa   :  { %v231_v51 = vadd.f32 %v587_v49, %v230_v50 }
 0x1ab   :  { %v686_v52 = vpop.f32.mrf.mxu1 }
 0x1ac   :  { %v236_v53 = vmax.f32 %v231_v51, 0.0 }
 0x1ad   :  { %v233_v54 = vpop.f32.mrf.mxu1 }
 0x1ae   :  { %v237_v55 = vpack.c.bf16 %v236_v53, %v236_v53 }
 0x1af   :  { %v687_v56 = vpop.f32.mrf.mxu1 }
 0x1b0   :  { %379 = vmatmul.mubr.bf16.vlgmr.msra.gmra.mxu0 %v237_v55 }
 0x270   :  { %v380_v4 = vpop.f32.mrf.mxu0 }
 0x271   :  { %v381_v5 = vadd.f32 %v380_v4, %v259_v2 }
 0x272   :  { %v382_v6 = vpop.f32.mrf.mxu0 }
 0x273   :  { %v383_v7 = vadd.f32 %v382_v6, %v263_v3  ;;  %v387_v8 = vmax.f32 %v381_v5, 0.0 }
 0x274   :  { %v384_v9 = vpop.f32.mrf.mxu0 }
 0x275   :  { %v388_v10 = vmax.f32 %v383_v7, 0.0  ;;  %v389_v13 = vpack.c.bf16 %v387_v8, %v387_v8 }
 0x276   :  { %v385_v11 = vpop.f32.mrf.mxu0 }
 0x277   :  { %v390_v12 = vpack.c.bf16 %v388_v10, %v388_v10 }
 0x279   :  { %558 = vmatprep.mubr.bf16.mxu1 %v390_v12 }
 0x27a   :  { %559 = vmatmul.mubr.bf16.vlgmr.msra.gmra.mxu1 %v389_v13 }
 0x33a   :  { %v656_v14 = vpop.f32.mrf.mxu1 }
 0x33c   :  { %v657_v16 = vpop.f32.mrf.mxu1 }
 0x33d   :  { %v658_v17 = vadd.f32 %v657_v16, %v656_v14 }
 0x33e   :  { %v659_v18 = vpop.f32.mrf.mxu1 }
 0x33f   :  { %v561_v19 = vadd.f32 %v658_v17, %v612_v15 }
 0x340   :  { %v660_v20 = vpop.f32.mrf.mxu1 }
 0x341   :  { %567 = vst.msk [vmem:[#allocation7] sm:$0xff] %vm566_vm2, %v561_v19 }
 0x342   :  { %796 = shalt.err (!%p793_p0)
}
 0x343   :  { %577 = dma.vmem_to_hbm [thread:$0]  %s575_s17, 128, %s998_s9, [#allocation4]  }
 0x344   :  { %809 = dma.done.wait [#allocation4], 128  }
 0x345   :  { %810 = vsyncadd [#allocation4], 4294967168 }
 0x346   :  { %581 = vsyncpa [#allocation3], 1 }
 0x347   :  { %582 = vsyncpa [#allocation6], 1 }
 0x348   :  { %583 = vsyncpa [#allocation4], 1 }

</bundles_post_ra>
